<compile_context>
chip_gen: v7x
topology: tpu7x:2x2x1
jax: 0.10.0
libtpu: 0.0.40
codegen_flags: <defaults>
</compile_context>

<pallas_src>
import functools

import jax
import jax.numpy as jnp
import numpy as np
from jax.experimental import pallas as pl
from jax.experimental.pallas import tpu as pltpu


# ----------------------------------------------------------------------------
# helpers
# ----------------------------------------------------------------------------
def _round_up(x, m):
    return (x + m - 1) // m * m


def _pick_block(n, cands=(512, 256, 128, 64, 32, 16, 8)):
    for c in cands:
        if n % c == 0:
            return c
    return n


_MM_COMPILER_PARAMS = pltpu.CompilerParams(
    dimension_semantics=("parallel", "parallel"),
    vmem_limit_bytes=32 * 1024 * 1024,
)


# ----------------------------------------------------------------------------
# Pallas kernels
# ----------------------------------------------------------------------------
def matmul_bias_kernel(x_ref, w_ref, b_ref, o_ref, *, relu):
    """o = [relu](x @ w + b).  Single full-K block: no K grid axis."""
    acc = jnp.dot(x_ref[...], w_ref[...], preferred_element_type=jnp.float32)
    acc = acc + b_ref[...]
    if relu:
        acc = jnp.maximum(acc, 0.0)
    o_ref[...] = acc.astype(o_ref.dtype)


def matmul_bias_res_kernel(x_ref, w_ref, b_ref, id_ref, o_ref, *, relu):
    """o = [relu](x @ w + b + identity) -- fused residual epilogue."""
    acc = jnp.dot(x_ref[...], w_ref[...], preferred_element_type=jnp.float32)
    acc = acc + b_ref[...] + id_ref[...].astype(jnp.float32)
    if relu:
        acc = jnp.maximum(acc, 0.0)
    o_ref[...] = acc.astype(o_ref.dtype)


def maxpool_kernel(*refs):
    """Elementwise max over k*k shifted taps (all blocks have the same shape)."""
    o_ref = refs[-1]
    out = refs[0][...]
    for r in refs[1:-1]:
        out = jnp.maximum(out, r[...])
    o_ref[...] = out


# ----------------------------------------------------------------------------
# Pallas wrappers
# ----------------------------------------------------------------------------
def matmul_bias(x, w, b, relu, identity=None):
    """(M,K)@(K,N)+b [+identity], optional ReLU.  bf16 in/out, f32 accum."""
    M, K = x.shape
    _, N = w.shape

    # Tile selection: one block covers all of K; N tiled at 256 lanes (full
    # extent when N <= 256); M tiled at <=256 rows, rounded to the 8-sublane
    # granule instead of padding tiny M (32 / 8) up to 128.
    tn = 256 if (N > 256 and N % 256 == 0) else N
    tm = min(256, _round_up(M, 8))
    Mp = _round_up(M, tm)
    Kp = _round_up(K, 128)

    # Guarded padding: only stem (K=147) and layer1 conv2 (K=576) need a K pad;
    # M and N are already aligned for every other resnet50 matmul here.
    xp = x if (Mp == M and Kp == K) else jnp.pad(x, ((0, Mp - M), (0, Kp - K)))
    wp = w if Kp == K else jnp.pad(w, ((0, Kp - K), (0, 0)))
    b2 = b.reshape(1, N)

    grid = (Mp // tm, N // tn)
    a_spec = pl.BlockSpec((tm, Kp), lambda i, j: (i, 0))
    w_spec = pl.BlockSpec((Kp, tn), lambda i, j: (0, j))
    b_spec = pl.BlockSpec((1, tn), lambda i, j: (0, j))
    o_spec = pl.BlockSpec((tm, tn), lambda i, j: (i, j))
    out_shape = jax.ShapeDtypeStruct((Mp, N), jnp.bfloat16)

    if identity is None:
        out = pl.pallas_call(
            functools.partial(matmul_bias_kernel, relu=relu),
            out_shape=out_shape,
            grid=grid,
            in_specs=[a_spec, w_spec, b_spec],
            out_specs=o_spec,
            compiler_params=_MM_COMPILER_PARAMS,
        )(xp, wp, b2)
    else:
        idp = identity if Mp == M else jnp.pad(identity, ((0, Mp - M), (0, 0)))
        id_spec = pl.BlockSpec((tm, tn), lambda i, j: (i, j))
        out = pl.pallas_call(
            functools.partial(matmul_bias_res_kernel, relu=relu),
            out_shape=out_shape,
            grid=grid,
            in_specs=[a_spec, w_spec, b_spec, id_spec],
            out_specs=o_spec,
            compiler_params=_MM_COMPILER_PARAMS,
        )(xp, wp, b2, idp)
    return out if Mp == M else out[:M]


def maxpool2d(x, k=3, stride=2, pad=1):
    """3x3/2 max pool.  Taps are fed as k*k separate inputs (no (9,M,C) stack)
    and reshaped to a lane-dense (rows, 128) layout."""
    n, h, w, c = x.shape
    oh = (h + 2 * pad - k) // stride + 1
    ow = (w + 2 * pad - k) // stride + 1
    xp = jnp.pad(x, ((0, 0), (pad, pad), (pad, pad), (0, 0)),
                 constant_values=-jnp.inf)
    m = n * oh * ow
    taps = [
        xp[:, di:di + stride * oh:stride, dj:dj + stride * ow:stride, :]
        .reshape(m, c)
        for di in range(k) for dj in range(k)
    ]
    if (m * c) % 128 == 0 and c < 128:
        rows, cols = (m * c) // 128, 128          # lane-dense view
        taps = [t.reshape(rows, cols) for t in taps]
    else:
        rows, cols = m, c
    bm = _pick_block(rows)

    out = pl.pallas_call(
        maxpool_kernel,
        out_shape=jax.ShapeDtypeStruct((rows, cols), x.dtype),
        grid=(rows // bm,),
        in_specs=[pl.BlockSpec((bm, cols), lambda i: (i, 0))] * (k * k),
        out_specs=pl.BlockSpec((bm, cols), lambda i: (i, 0)),
        compiler_params=pltpu.CompilerParams(
            dimension_semantics=("parallel",)),
    )(*taps)
    return out.reshape(n, oh, ow, c)


# ----------------------------------------------------------------------------
# Conv (+folded BN) via im2col + Pallas matmul (fused bias/ReLU/residual)
# ----------------------------------------------------------------------------
def conv_bn(x, w_mat, bias, k, stride, pad, relu, identity=None):
    """x: NHWC bf16, w_mat: (k*k*Cin, Cout) bf16 laid out as (di, dj, cin)."""
    n, h, w, c = x.shape
    oh = (h + 2 * pad - k) // stride + 1
    ow = (w + 2 * pad - k) // stride + 1
    if k == 1 and pad == 0:
        src = x if stride == 1 else x[:, ::stride, ::stride, :]
        cols = src.reshape(n * oh * ow, c)
    else:
        xp = jnp.pad(x, ((0, 0), (pad, pad), (pad, pad), (0, 0)))
        patches = [
            xp[:, di:di + stride * oh:stride, dj:dj + stride * ow:stride, :]
            for di in range(k) for dj in range(k)
        ]
        cols = jnp.concatenate(patches, axis=-1).reshape(n * oh * ow, k * k * c)
    id_mat = None if identity is None else identity.reshape(n * oh * ow, -1)
    out = matmul_bias(cols, w_mat, bias, relu, id_mat)
    return out.reshape(n, oh, ow, -1)


# ----------------------------------------------------------------------------
# Deterministic parameter generation (random, resnet50 shapes) + BN folding
# ----------------------------------------------------------------------------
class ParamGen:
    def __init__(self, seed=0):
        self.key = jax.random.PRNGKey(seed)

    def next(self):
        self.key, sub = jax.random.split(self.key)
        return sub


def make_conv_bn(pg, cin, cout, k):
    fan_in = cin * k * k
    w = jax.random.normal(pg.next(), (cout, cin, k, k), jnp.float32) / np.sqrt(fan_in)
    gamma = jax.random.uniform(pg.next(), (cout,), jnp.float32, 0.8, 1.2)
    beta = 0.1 * jax.random.normal(pg.next(), (cout,), jnp.float32)
    mean = 0.1 * jax.random.normal(pg.next(), (cout,), jnp.float32)
    var = jax.random.uniform(pg.next(), (cout,), jnp.float32, 0.8, 1.2)
    scale = gamma / jnp.sqrt(var + 1e-5)
    w_f = w * scale[:, None, None, None]
    b_f = beta - mean * scale
    # rows ordered (di, dj, cin) to match im2col concatenation order
    w_mat = jnp.transpose(w_f, (2, 3, 1, 0)).reshape(k * k * cin, cout)
    return w_mat.astype(jnp.bfloat16), b_f            # bf16 weights, f32 bias


def make_layer(pg, inplanes, planes, blocks, stride):
    layer = []
    p = {
        "conv1": make_conv_bn(pg, inplanes, planes, 1),
        "conv2": make_conv_bn(pg, planes, planes, 3),
        "conv3": make_conv_bn(pg, planes, planes * 4, 1),
        "downsample": make_conv_bn(pg, inplanes, planes * 4, 1),
    }
    layer.append((p, stride))
    for _ in range(blocks - 1):
        p = {
            "conv1": make_conv_bn(pg, planes * 4, planes, 1),
            "conv2": make_conv_bn(pg, planes, planes, 3),
            "conv3": make_conv_bn(pg, planes, planes * 4, 1),
        }
        layer.append((p, 1))
    return layer


def make_resnet50_params(seed=0):
    pg = ParamGen(seed)
    params = {"stem": make_conv_bn(pg, 3, 64, 7)}
    params["layer1"] = make_layer(pg, 64, 64, 3, 1)
    params["layer2"] = make_layer(pg, 256, 128, 4, 2)
    params["layer3"] = make_layer(pg, 512, 256, 6, 2)
    params["layer4"] = make_layer(pg, 1024, 512, 3, 2)
    return params


# ----------------------------------------------------------------------------
# Forward (timm resnet50 features_only -> 5 feature maps, strides 2..32)
# ----------------------------------------------------------------------------
def bottleneck(x, p, stride):
    if "downsample" in p:
        identity = conv_bn(x, *p["downsample"], k=1, stride=stride, pad=0,
                           relu=False)
    else:
        identity = x
    out = conv_bn(x, *p["conv1"], k=1, stride=1, pad=0, relu=True)
    out = conv_bn(out, *p["conv2"], k=3, stride=stride, pad=1, relu=True)
    # residual add + final ReLU fused into the conv3 matmul epilogue
    out = conv_bn(out, *p["conv3"], k=1, stride=1, pad=0, relu=True,
                  identity=identity)
    return out


def downsample_forward(x_nchw, params):
    """Equivalent of DownSample.forward: returns list of 5 NCHW feature maps."""
    x = jnp.transpose(x_nchw, (0, 2, 3, 1)).astype(jnp.bfloat16)  # NHWC bf16
    feats = []
    x = conv_bn(x, *params["stem"], k=7, stride=2, pad=3, relu=True)
    feats.append(x)                       # stride 2,   64 ch (after act1)
    x = maxpool2d(x, k=3, stride=2, pad=1)
    for name in ("layer1", "layer2", "layer3", "layer4"):
        for p, s in params[name]:
            x = bottleneck(x, p, s)
        feats.append(x)                   # strides 4/8/16/32
    # back to NCHW f32 only at the module boundary
    return [jnp.transpose(f, (0, 3, 1, 2)).astype(jnp.float32) for f in feats]


# ----------------------------------------------------------------------------
if __name__ == "__main__":
    params = make_resnet50_params(seed=0)

    key = jax.random.PRNGKey(0)
    x = jax.random.normal(key, (2, 3, 64, 64), jnp.float32)  # NCHW like PyTorch

    feats = downsample_forward(x, params)
    feats = jax.block_until_ready(feats)

    expected = [(2, 64, 32, 32), (2, 256, 16, 16), (2, 512, 8, 8),
                (2, 1024, 4, 4), (2, 2048, 2, 2)]
    assert [tuple(f.shape) for f in feats] == expected, \
        [tuple(f.shape) for f in feats]
    assert all(f.dtype == jnp.float32 for f in feats)
    assert all(bool(jnp.all(jnp.isfinite(f))) for f in feats)

    print("KERNEL_OK")
</pallas_src>

<mosaic_0001>
module attributes {stable_mosaic.version = 11 : i64} {
  func.func @matmul_bias_kernel(%arg0: i32, %arg1: i32, %arg2: memref<256x256xbf16, #tpu.memory_space<vmem>>, %arg3: memref<256x64xbf16, #tpu.memory_space<vmem>>, %arg4: memref<1x64xf32, #tpu.memory_space<vmem>>, %arg5: memref<256x64xbf16, #tpu.memory_space<vmem>>) attributes {dimension_semantics = [#tpu.dimension_semantics<parallel>, #tpu.dimension_semantics<parallel>], iteration_bounds = array<i64: 8, 1>, scalar_prefetch = 0 : i64, scratch_operands = 0 : i64, tpu.core_type = #tpu.core_type<tc>, window_params = [{transform_indices = @transform_0, window_bounds = array<i64: 256, 256>}, {transform_indices = @transform_1, window_bounds = array<i64: 256, 64>}, {transform_indices = @transform_2, window_bounds = array<i64: 1, 64>}, {transform_indices = @transform_3, window_bounds = array<i64: 256, 64>}]} {
    %c0 = arith.constant 0 : index
    %c0_0 = arith.constant 0 : index
    %0 = vector.load %arg2[%c0, %c0_0] : memref<256x256xbf16, #tpu.memory_space<vmem>>, vector<256x256xbf16>
    %c0_1 = arith.constant 0 : index
    %c0_2 = arith.constant 0 : index
    %1 = vector.load %arg3[%c0_1, %c0_2] : memref<256x64xbf16, #tpu.memory_space<vmem>>, vector<256x64xbf16>
    %cst = arith.constant dense<0.000000e+00> : vector<256x64xf32>
    %2 = tpu.matmul %0, %1, %cst {dimension_numbers = #tpu.dot_dimension_numbers<[1], [0], [0], [1], [0, 0, 1, 1], [], []>} : vector<256x256xbf16>, vector<256x64xbf16>, vector<256x64xf32> -> vector<256x64xf32>
    %c0_3 = arith.constant 0 : index
    %c0_4 = arith.constant 0 : index
    %3 = vector.load %arg4[%c0_3, %c0_4] : memref<1x64xf32, #tpu.memory_space<vmem>>, vector<1x64xf32>
    %4 = vector.broadcast %3 : vector<1x64xf32> to vector<256x64xf32>
    %5 = arith.addf %2, %4 : vector<256x64xf32>
    %cst_5 = arith.constant 0.000000e+00 : f32
    %6 = vector.broadcast %cst_5 : f32 to vector<256x64xf32>
    %7 = arith.maximumf %5, %6 : vector<256x64xf32>
    %8 = arith.truncf %7 : vector<256x64xf32> to vector<256x64xbf16>
    %c0_6 = arith.constant 0 : index
    %c0_7 = arith.constant 0 : index
    %9 = vector.load %arg5[%c0_6, %c0_7] : memref<256x64xbf16, #tpu.memory_space<vmem>>, vector<256x64xbf16>
    tpu.vector_store %arg5[%c0_6, %c0_7], %8 {strides = array<i32>} : memref<256x64xbf16, #tpu.memory_space<vmem>>, vector<256x64xbf16>,
    return
  }
  func.func @transform_0(%arg0: i32, %arg1: i32) -> (i32, i32) {
    %c0_i32 = arith.constant 0 : i32
    %c0_i32_0 = arith.constant 0 : i32
    return %arg0, %c0_i32 : i32, i32
  }
  func.func @transform_1(%arg0: i32, %arg1: i32) -> (i32, i32) {
    %c0_i32 = arith.constant 0 : i32
    %c0_i32_0 = arith.constant 0 : i32
    return %c0_i32, %arg1 : i32, i32
  }
  func.func @transform_2(%arg0: i32, %arg1: i32) -> (i32, i32) {
    %c0_i32 = arith.constant 0 : i32
    %c0_i32_0 = arith.constant 0 : i32
    return %c0_i32, %arg1 : i32, i32
  }
  func.func @transform_3(%arg0: i32, %arg1: i32) -> (i32, i32) {
    %c0_i32 = arith.constant 0 : i32
    return %arg0, %arg1 : i32, i32
  }
}

</mosaic_0001>

<bundles_post_ra>
// kernel: tpu_custom_call.1
= control target key start
LH: loop header
LB: loop body
LE: loop exit
PB: predicated region body
PF: predicated region fallthrough
CT: control target
= control target key end

     0   :  { %8 = vsyncpa [#allocation3], 0  ;;  %s1833_s0 = inlined_call_operand.hbm [shape: bf16[2048,256], index: 0, kind: input, shape index: {}]   ;;  %s1834_s1 = inlined_call_operand.vmem [shape: bf16[256,64], index: 1, kind: input, shape index: {}]   ;;  %s1835_s2 = inlined_call_operand.vmem [shape: f32[1,64], index: 2, kind: input, shape index: {}]   ;;  %s1836_s3 = inlined_call_operand.vmem [shape: bf16[2048,64], index: 3, kind: output, shape index: {}]  }
   0x1   :  { %10 = vsyncpa [#allocation3 + $0x1], 0  ;;  %s1525_s12 = smov 0   ;;  %s1527_s13 = smov 0  }
   0x2   :  { %s1529_s14 = smov 0   ;;  %s1531_s15 = smov 0  }
   0x3   :  { %s1533_s16 = smov 0   ;;  %s1535_s17 = smov 0  }
   0x4 LB: > { %s1040_s18 = sadd.s32 4294967295, %s1500_s17   ;;  %s28_s19 = sadd.s32 1, %s1496_s16  ;;  %s1500_s17 = sphi %s1535_s17, %s16_s17   ;;  %s1496_s16 = sphi %s1533_s16, %s1844_s16   ;;  %s1492_s15 = sphi %s1531_s15, %s1843_s15   ;;  %s1488_s14 = sphi %s1529_s14, %s1842_s14   ;;  %s1484_s13 = sphi %s1527_s13, %s1841_s13   ;;  %s1480_s12 = sphi %s1525_s12, %s1840_s12  }
   0x5   : > { %p30_p0 = scmp.ge.s32.totalorder %s28_s19, 8  ;;  %s35_s20 = sadd.s32 1, %s1488_s14 }
   0x6   : > { %p42_p1 = scmp.ne.s32.totalorder %s1488_s14, %s1484_s13  ;;  %p43_p2 = scmp.eq.s32.totalorder %s1500_s17, 0 }
   0x7   : > { %s1846_s19 = smov (%p30_p0, %s28_s19), 0  ;;  %p48_p4 = scmp.ne.s32.totalorder %s1484_s13, %s1480_s12 }
   0x8   : > { %p1561_p3 = por %p43_p2, %p42_p1  ;;  %s32_s22 = ssub.s32 %s1496_s16, %s1846_s19 }
   0x9   : > { %p49_p5 = scmp.eq.s32.totalorder %s1040_s18, 0  ;;  %p33_p6 = scmp.eq.s32.totalorder %s32_s22, 0 }
   0xa   : > { %p1305_p8 = scmp.lt.s32.totalorder %s1500_s17, 8  ;;  %s165_s25 = sand.u32 1, %s1488_s14  }
   0xb   : > { %p1568_p7 = por %p49_p5, %p48_p4  ;;  %s1138_s26 = sshll.u32 %s1496_s16, 12 }
   0xc   : > { %s1574_s24 = scalar_select %p33_p6, %s1488_s14, %s35_s20  }
   0xd   : > { %s1046_s27 = sshll.u32 %s165_s25, 8  ;;  %s1581_s30 = scalar_lea.hbm %s1833_s0, %s1138_s26 }
   0xe   : > { %s169_s4 = scalar_lea.vmem [#allocation2], %s1046_s27  ;;  %p1585_p9 = pnand %p1305_p8, %p1561_p3 }
   0xf   : > { %s177_s5 = sshll.u32 %s169_s4, 4  ;;  %s1591_s7 = scalar_lea.sflag [#allocation3], %s165_s25  ;;  %s1589_s5 = int_to_ptr.vmem [resolvable:$true] %s177_s5 }
  0x10   : > { %s1420_s8 = scalar_lea.hbm %s1581_s30, 4096  ;;  %p1422_p11 = pneg %p1585_p9 }
  0x11   : > { %p1421_p10 = scmp.ne.s32.totalorder %s1581_s30, %s1420_s8  ;;  %s1425_s11 = scalar_lea.hbm %s1833_s0, 32768 }
  0x12   : > { %p1426_p0 = scmp.lt.u32.totalorder %s1581_s30, %s1833_s0  ;;  %p1427_p1 = scmp.lt.u32.totalorder %s1425_s11, %s1420_s8 }
  0x13   : > { %p1423_p12 = pnand %p1422_p11, %p1421_p10  ;;  %p1429_p3 = scmp.lt.u32.totalorder %s1420_s8, %s1581_s30 }
  0x14   : > { %p1428_p2 = por %p1427_p1, %p1426_p0 }
  0x15   : > { %p1424_p13 = pneg %p1423_p12 }
  0x16   : > { %p1430_p4 = por %p1429_p3, %p1428_p2 }
  0x18   : > { %p1431_p5 = pnand %p1430_p4, %p1424_p13 }
  0x1a   : > { %1434 = shalt.err (!%p1431_p5)
}
  0x1b   : > { %s1435_s20 = scalar_lea.vmem %s1589_s5, 4096  ;;  %s1502_s21 = smov [#allocation2]  }
  0x1c   : > { %p1436_p6 = scmp.ne.s32.totalorder %s1589_s5, %s1435_s20  ;;  %s1440_s22 = sshll.u32 %s1502_s21, 4  ;;  %s1441_s22 = int_to_ptr.vmem [resolvable:$false] %s1440_s22 }
  0x1d   : > { %s1442_s25 = scalar_lea.vmem %s1441_s22, 8192  ;;  %p1443_p12 = scmp.lt.s32.totalorder %s1589_s5, %s1441_s22 }
  0x1e   : > { %p1438_p8 = pnand %p1436_p6, %p1422_p11  ;;  %p1444_p0 = scmp.lt.s32.totalorder %s1442_s25, %s1435_s20 }
  0x20   : > { %p1439_p10 = pneg %p1438_p8  ;;  %p1445_p1 = por %p1444_p0, %p1443_p12 }
  0x22   : > { %p1446_p2 = pnand %p1445_p1, %p1439_p10 }
  0x24   : > { %1449 = shalt.err (!%p1446_p2)
}
  0x25   : > { %s1503_s26 = smov 128   ;;  %s1504_s27 = smov 8  }
  0x26   : > { %1304 = dma.hbm_to_vmem [thread:$0]  (!%p1585_p9), %s1581_s30, 4096, %s1589_s5, %s1591_s7, %s1503_s26, %s1503_s26, %s1504_s27  }
  0x27   : > { %p1050_p11 = scmp.ge.s32.totalorder %s1500_s17, 1  ;;  %p185_p13 = scmp.lt.s32.totalorder %s1500_s17, 9 }
  0x29   : > { %p186_p3 = pnand %p1050_p11, %p185_p13 }
  0x2a   : > { %s191_s28 = sand.u32 (!%p186_p3), 1, %s1484_s13  }
  0x2b   : > { %189 = sbr.rel (%p186_p3) target bundleno = 364 (0x16c), region = 32  ;;  %s1051_s29 = sshll.u32 (!%p186_p3), %s191_s28, 8 }
  0x2c   : > { %s192_s4 = scalar_lea.sflag (!%p186_p3), [#allocation3], %s191_s28  ;;  %s1622_s8 = scalar_lea.vmem (!%p186_p3), [#allocation2], %s1051_s29 }
  0x32   : > { %1475 = dma.done.wait (%p1568_p7), %s192_s4, 4096  }
  0x33   : > { %1477 = vsyncadd (%p1568_p7), %s192_s4, 4294963200  ;;  %v1356_v0 = vld [vmem:[%s1834_s1 + $0x40] sm:$0xff]   ;;  %v1358_v2 = vld [vmem:[%s1834_s1 + $0x48] sm:$0xff]   ;;  %s1052_s25 = sshll.u32 %s1492_s15, 5  ;;  %vm894_vm0 = vcmask 519168  }
  0x34   : > { %v1357_v1 = vld [vmem:[%s1834_s1] sm:$0xff]   ;;  %1171 = vmatprep.subr.bf16.mxu0 %v1356_v0  ;;  %1283 = vmatprep.subr.bf16.mxu1 %v1356_v0  ;;  %v1359_v3 = vld [vmem:[%s1834_s1 + $0x8] sm:$0xff]   ;;  %v1360_v4 = vld [vmem:[%s1834_s1 + $0x50] sm:$0xff]   ;;  %p237_p7 = scmp.lt.s32.totalorder %s1052_s25, 255 }
  0x35   : > { %1172 = vmatpush3.bf16.msra.mxu0 %v1357_v1  ;;  %1291 = vmatpush3.bf16.msra.mxu1 %v1357_v1  ;;  %v1361_v5 = vld [vmem:[%s1834_s1 + $0x10] sm:$0xff]   ;;  %v1362_v6 = vld [vmem:[%s1834_s1 + $0x58] sm:$0xff]   ;;  %v1364_v8 = vld [vmem:[%s1834_s1 + $0x60] sm:$0xff]  }
  0x36   : > { %1173 = vmatprep.subr.bf16.mxu0 %v1358_v2  ;;  %1284 = vmatprep.subr.bf16.mxu1 %v1358_v2  ;;  %v1363_v7 = vld [vmem:[%s1834_s1 + $0x18] sm:$0xff]   ;;  %v1365_v9 = vld [vmem:[%s1834_s1 + $0x20] sm:$0xff]   ;;  %v1366_v10 = vld [vmem:[%s1834_s1 + $0x68] sm:$0xff]   ;;  %s1848_s25 = smov (!%p237_p7, %s1052_s25), 255 }
  0x37   : > { %v1374_v11 = vld [vmem:[%s1622_s8 + $0x4] ss:$8 sps:$4 sm:$0xff]   ;;  %v1368_v14 = vld [vmem:[%s1834_s1 + $0x70] sm:$0xff]   ;;  %v1370_v16 = vld [vmem:[%s1834_s1 + $0x78] sm:$0xff]  }
  0x38   : > { %v1377_v12 = vld [vmem:[%s1622_s8 + $0x84] ss:$8 sps:$4 sm:$0xff]   ;;  %605 = vmatprep.mubr.bf16.mxu0 %v1374_v11  ;;  %v1369_v15 = vld [vmem:[%s1834_s1 + $0x30] sm:$0xff]   ;;  %v1371_v17 = vld [vmem:[%s1834_s1 + $0x38] sm:$0xff]  }
  0x39   : > { %1174 = vmatpush3.bf16.msra.mxu0 %v1359_v3  ;;  %1292 = vmatpush3.bf16.msra.mxu1 %v1359_v3  ;;  %v1367_v13 = vld [vmem:[%s1834_s1 + $0x28] sm:$0xff]   ;;  %v1378_v20 = vld [vmem:[%s1622_s8 + $0x14] ss:$8 sps:$4 sm:$0xff]   ;;  %v1382_v22 = vld [vmem:[%s1622_s8 + $0x10] ss:$8 sps:$4 sm:$0xff]  }
  0x3a   : > { %1175 = vmatprep.subr.bf16.mxu0 %v1360_v4  ;;  %1285 = vmatprep.subr.bf16.mxu1 %v1360_v4  ;;  %v1372_v18 = vld [vmem:[%s1622_s8] ss:$8 sps:$4 sm:$0xff]   ;;  %v1380_v21 = vld [vmem:[%s1622_s8 + $0x94] ss:$8 sps:$4 sm:$0xff]   ;;  %v1383_v23 = vld [vmem:[%s1622_s8 + $0x90] ss:$8 sps:$4 sm:$0xff]  }
  0x3b   : > { %669 = vmatprep.mubr.bf16.mxu1 %v1377_v12  ;;  %v1375_v19 = vld [vmem:[%s1622_s8 + $0x80] ss:$8 sps:$4 sm:$0xff]   ;;  %v1384_v24 = vld [vmem:[%s1622_s8 + $0x24] ss:$8 sps:$4 sm:$0xff]   ;;  %v1390_v28 = vld [vmem:[%s1622_s8 + $0x34] ss:$8 sps:$4 sm:$0xff]  }
  0x3c   : > { %v1386_v25 = vld [vmem:[%s1622_s8 + $0xa4] ss:$8 sps:$4 sm:$0xff]   ;;  %v1388_v26 = vld [vmem:[%s1622_s8 + $0x20] ss:$8 sps:$4 sm:$0xff]   ;;  %v1392_v29 = vld [vmem:[%s1622_s8 + $0xb4] ss:$8 sps:$4 sm:$0xff]  }
  0x3d   : > { %1176 = vmatpush3.bf16.msra.mxu0 %v1361_v5  ;;  %1293 = vmatpush3.bf16.msra.mxu1 %v1361_v5  ;;  %v1389_v27 = vld [vmem:[%s1622_s8 + $0xa0] ss:$8 sps:$4 sm:$0xff]   ;;  %v1394_v30 = vld [vmem:[%s1622_s8 + $0x30] ss:$8 sps:$4 sm:$0xff]   ;;  %v1396_v32 = vld [vmem:[%s1622_s8 + $0x44] ss:$8 sps:$4 sm:$0xff]  }
  0x3e   : > { %1177 = vmatprep.subr.bf16.mxu0 %v1362_v6  ;;  %1286 = vmatprep.subr.bf16.mxu1 %v1362_v6  ;;  %v1395_v31 = vld [vmem:[%s1622_s8 + $0xb0] ss:$8 sps:$4 sm:$0xff]   ;;  %v1398_v33 = vld [vmem:[%s1622_s8 + $0xc4] ss:$8 sps:$4 sm:$0xff]   ;;  %v1400_v34 = vld [vmem:[%s1622_s8 + $0x40] ss:$8 sps:$4 sm:$0xff]  }
  0x3f   : > { %v1401_v35 = vld [vmem:[%s1622_s8 + $0xc0] ss:$8 sps:$4 sm:$0xff]   ;;  %v1402_v36 = vld [vmem:[%s1622_s8 + $0x54] ss:$8 sps:$4 sm:$0xff]   ;;  %v1406_v38 = vld [vmem:[%s1622_s8 + $0x50] ss:$8 sps:$4 sm:$0xff]  }
  0x40   : > { %v1404_v37 = vld [vmem:[%s1622_s8 + $0xd4] ss:$8 sps:$4 sm:$0xff]   ;;  %v1407_v39 = vld [vmem:[%s1622_s8 + $0xd0] ss:$8 sps:$4 sm:$0xff]   ;;  %v1408_v40 = vld [vmem:[%s1622_s8 + $0x64] ss:$8 sps:$4 sm:$0xff]  }
  0x41   : > { %1178 = vmatpush3.bf16.msra.mxu0 %v1363_v7  ;;  %1294 = vmatpush3.bf16.msra.mxu1 %v1363_v7  ;;  %v1410_v41 = vld [vmem:[%s1622_s8 + $0xe4] ss:$8 sps:$4 sm:$0xff]   ;;  %v1412_v42 = vld [vmem:[%s1622_s8 + $0x60] ss:$8 sps:$4 sm:$0xff]   ;;  %v1414_v44 = vld [vmem:[%s1622_s8 + $0x74] ss:$8 sps:$4 sm:$0xff]  }
  0x42   : > { %1179 = vmatprep.subr.bf16.mxu0 %v1364_v8  ;;  %1287 = vmatprep.subr.bf16.mxu1 %v1364_v8  ;;  %v1413_v43 = vld [vmem:[%s1622_s8 + $0xe0] ss:$8 sps:$4 sm:$0xff]   ;;  %v1416_v45 = vld [vmem:[%s1622_s8 + $0xf4] ss:$8 sps:$4 sm:$0xff]   ;;  %v1418_v46 = vld [vmem:[%s1622_s8 + $0x70] ss:$8 sps:$4 sm:$0xff]  }
  0x43   : > { %v1419_v47 = vld [vmem:[%s1622_s8 + $0xf0] ss:$8 sps:$4 sm:$0xff]   ;;  %v1712_v50 = vld [vmem:[%s1835_s2] ss:$0 sm:$0xff]  ;;  %s1053_s8 = sshll.u32 %s1848_s25, 2 }
  0x44   : > { %s1721_s29 = scalar_lea.vmem %s1836_s3, %s1053_s8 }
  0x45   : > { %1180 = vmatpush3.bf16.msra.mxu0 %v1365_v9  ;;  %1295 = vmatpush3.bf16.msra.mxu1 %v1365_v9 }
  0x46   : > { %1181 = vmatprep.subr.bf16.mxu0 %v1366_v10  ;;  %1288 = vmatprep.subr.bf16.mxu1 %v1366_v10 }
  0x49   : > { %1182 = vmatpush3.bf16.msra.mxu0 %v1367_v13  ;;  %1296 = vmatpush3.bf16.msra.mxu1 %v1367_v13 }
  0x4a   : > { %1183 = vmatprep.subr.bf16.mxu0 %v1368_v14  ;;  %1289 = vmatprep.subr.bf16.mxu1 %v1368_v14 }
  0x4d   : > { %1184 = vmatpush3.bf16.msra.mxu0 %v1369_v15  ;;  %1297 = vmatpush3.bf16.msra.mxu1 %v1369_v15 }
  0x4e   : > { %1185 = vmatprep.subr.bf16.mxu0 %v1370_v16  ;;  %1290 = vmatprep.subr.bf16.mxu1 %v1370_v16 }
  0x51   : > { %1186 = vmatpush3.bf16.msra.mxu0 %v1371_v17  ;;  %1298 = vmatpush3.bf16.msra.mxu1 %v1371_v17 }
  0x54   : > { %606 = vmatmul.mubr.bf16.vlgmr.msra.gmra.mrb[0].mxu0 %v1372_v18  ;;  %670 = vmatmul.mubr.bf16.vlgmr.msra.gmra.mrb[0].mxu1 %v1375_v19 }
  0x55   : > { %613 = vmatprep.mubr.bf16.mxu0 %v1378_v20  ;;  %677 = vmatprep.mubr.bf16.mxu1 %v1380_v21 }
  0x5c   : > { %614 = vmatmul.mubr.bf16.gmra.mrb[4].mxu0 %v1382_v22  ;;  %678 = vmatmul.mubr.bf16.gmra.mrb[4].mxu1 %v1383_v23 }
  0x5d   : > { %621 = vmatprep.mubr.bf16.mxu0 %v1384_v24  ;;  %685 = vmatprep.mubr.bf16.mxu1 %v1386_v25 }
  0x64   : > { %622 = vmatmul.mubr.bf16.gmra.mrb[8].mxu0 %v1388_v26  ;;  %686 = vmatmul.mubr.bf16.gmra.mrb[8].mxu1 %v1389_v27 }
  0x65   : > { %629 = vmatprep.mubr.bf16.mxu0 %v1390_v28  ;;  %693 = vmatprep.mubr.bf16.mxu1 %v1392_v29 }
  0x6c   : > { %630 = vmatmul.mubr.bf16.gmra.mrb[12].mxu0 %v1394_v30  ;;  %694 = vmatmul.mubr.bf16.gmra.mrb[12].mxu1 %v1395_v31 }
  0x6d   : > { %637 = vmatprep.mubr.bf16.mxu0 %v1396_v32  ;;  %701 = vmatprep.mubr.bf16.mxu1 %v1398_v33 }
  0x74   : > { %638 = vmatmul.mubr.bf16.gmra.mrb[16].mxu0 %v1400_v34  ;;  %702 = vmatmul.mubr.bf16.gmra.mrb[16].mxu1 %v1401_v35 }
  0x75   : > { %645 = vmatprep.mubr.bf16.mxu0 %v1402_v36  ;;  %709 = vmatprep.mubr.bf16.mxu1 %v1404_v37 }
  0x7c   : > { %646 = vmatmul.mubr.bf16.gmra.mrb[20].mxu0 %v1406_v38  ;;  %710 = vmatmul.mubr.bf16.gmra.mrb[20].mxu1 %v1407_v39 }
  0x7d   : > { %653 = vmatprep.mubr.bf16.mxu0 %v1408_v40  ;;  %717 = vmatprep.mubr.bf16.mxu1 %v1410_v41 }
  0x84   : > { %654 = vmatmul.mubr.bf16.gmra.mrb[24].mxu0 %v1412_v42  ;;  %718 = vmatmul.mubr.bf16.gmra.mrb[24].mxu1 %v1413_v43 }
  0x85   : > { %661 = vmatprep.mubr.bf16.mxu0 %v1414_v44  ;;  %725 = vmatprep.mubr.bf16.mxu1 %v1416_v45 }
  0x8c   : > { %662 = vmatmul.mubr.bf16.gmra.mrb[28].mxu0 %v1418_v46  ;;  %726 = vmatmul.mubr.bf16.gmra.mrb[28].mxu1 %v1419_v47 }
 0x127   : > { %v1187_v48 = vpop.f32.mrb[0].mxu0  ;;  %v1235_v49 = vpop.f32.mrb[0].mxu1 }
 0x128   : > { %v1188_v51 = vpop.f32.mrb[1].mxu0  ;;  %v1236_v52 = vpop.f32.mrb[1].mxu1 }
 0x129   : > { %v1189_v53 = vadd.f32 %v1188_v51, %v1187_v48  ;;  %v1237_v54 = vadd.f32 %v1236_v52, %v1235_v49  ;;  %v1190_v55 = vpop.f32.mrb[2].mxu0  ;;  %v1238_v56 = vpop.f32.mrb[2].mxu1 }
 0x12a   : > { %v1191_v57 = vpop.f32.mrb[3].mxu0  ;;  %v1239_v58 = vpop.f32.mrb[3].mxu1 }
 0x12b   : > { %v608_v59 = vadd.f32 %v1189_v53, %v1712_v50  ;;  %v672_v60 = vadd.f32 %v1237_v54, %v1712_v50  ;;  %v1192_v61 = vadd.f32 %v1191_v57, %v1190_v55  ;;  %v1240_v62 = vadd.f32 %v1239_v58, %v1238_v56 }
 0x12d   : > { %v734_v63 = vmax.f32 %v608_v59, 0.0  ;;  %v750_v0 = vmax.f32 %v672_v60, 0.0  ;;  %v611_v1 = vadd.f32 %v1192_v61, %v1712_v50  ;;  %v675_v2 = vadd.f32 %v1240_v62, %v1712_v50 }
 0x12f   : > { %v1139_v3 = vpack.c.bf16 %v734_v63, %v734_v63  ;;  %v1155_v4 = vpack.c.bf16 %v750_v0, %v750_v0  ;;  %v735_v5 = vmax.f32 %v611_v1, 0.0  ;;  %v751_v6 = vmax.f32 %v675_v2, 0.0  ;;  %v1193_v7 = vpop.f32.mrb[4].mxu0  ;;  %v1241_v8 = vpop.f32.mrb[4].mxu1 }
 0x130   : > { %v1194_v9 = vpop.f32.mrb[5].mxu0  ;;  %v1242_v10 = vpop.f32.mrb[5].mxu1 }
 0x131   : > { %895 = vst.msk [vmem:[%s1721_s29] sm:$0xf] %vm894_vm0, %v1139_v3  ;;  %911 = vst.msk [vmem:[%s1721_s29 + $0x40] sm:$0xf] %vm894_vm0, %v1155_v4  ;;  %v1140_v11 = vpack.c.bf16 %v735_v5, %v735_v5  ;;  %v1156_v12 = vpack.c.bf16 %v751_v6, %v751_v6  ;;  %v1195_v13 = vadd.f32 %v1194_v9, %v1193_v7  ;;  %v1196_v15 = vpop.f32.mrb[6].mxu0  ;;  %v1244_v16 = vpop.f32.mrb[6].mxu1 }
 0x132   : > { %v1243_v14 = vadd.f32 %v1242_v10, %v1241_v8  ;;  %v1197_v17 = vpop.f32.mrb[7].mxu0  ;;  %v1245_v18 = vpop.f32.mrb[7].mxu1 }
 0x133   : > { %896 = vst.msk [vmem:[%s1721_s29 + $0x4] sm:$0xf] %vm894_vm0, %v1140_v11  ;;  %912 = vst.msk [vmem:[%s1721_s29 + $0x44] sm:$0xf] %vm894_vm0, %v1156_v12  ;;  %v616_v19 = vadd.f32 %v1195_v13, %v1712_v50  ;;  %v1198_v21 = vadd.f32 %v1197_v17, %v1196_v15  ;;  %v1246_v22 = vadd.f32 %v1245_v18, %v1244_v16 }
 0x134   : > { %v680_v20 = vadd.f32 %v1243_v14, %v1712_v50 }
 0x135   : > { %v736_v23 = vmax.f32 %v616_v19, 0.0  ;;  %v619_v25 = vadd.f32 %v1198_v21, %v1712_v50  ;;  %v683_v26 = vadd.f32 %v1246_v22, %v1712_v50 }
 0x136   : > { %v752_v24 = vmax.f32 %v680_v20, 0.0 }
 0x137   : > { %v1141_v27 = vpack.c.bf16 %v736_v23, %v736_v23  ;;  %v737_v29 = vmax.f32 %v619_v25, 0.0  ;;  %v753_v30 = vmax.f32 %v683_v26, 0.0  ;;  %v1199_v31 = vpop.f32.mrb[8].mxu0  ;;  %v1247_v32 = vpop.f32.mrb[8].mxu1 }
 0x138   : > { %v1157_v28 = vpack.c.bf16 %v752_v24, %v752_v24  ;;  %v1200_v33 = vpop.f32.mrb[9].mxu0  ;;  %v1248_v34 = vpop.f32.mrb[9].mxu1 }
 0x139   : > { %897 = vst.msk [vmem:[%s1721_s29 + $0x8] sm:$0xf] %vm894_vm0, %v1141_v27  ;;  %v1142_v35 = vpack.c.bf16 %v737_v29, %v737_v29  ;;  %v1158_v36 = vpack.c.bf16 %v753_v30, %v753_v30  ;;  %v1201_v37 = vadd.f32 %v1200_v33, %v1199_v31  ;;  %v1249_v38 = vadd.f32 %v1248_v34, %v1247_v32  ;;  %v1202_v39 = vpop.f32.mrb[10].mxu0  ;;  %v1250_v40 = vpop.f32.mrb[10].mxu1 }
 0x13a   : > { %913 = vst.msk [vmem:[%s1721_s29 + $0x48] sm:$0xf] %vm894_vm0, %v1157_v28  ;;  %v1203_v41 = vpop.f32.mrb[11].mxu0  ;;  %v1251_v42 = vpop.f32.mrb[11].mxu1 }
 0x13b   : > { %898 = vst.msk [vmem:[%s1721_s29 + $0xc] sm:$0xf] %vm894_vm0, %v1142_v35  ;;  %914 = vst.msk [vmem:[%s1721_s29 + $0x4c] sm:$0xf] %vm894_vm0, %v1158_v36  ;;  %v624_v43 = vadd.f32 %v1201_v37, %v1712_v50  ;;  %v688_v44 = vadd.f32 %v1249_v38, %v1712_v50  ;;  %v1204_v45 = vadd.f32 %v1203_v41, %v1202_v39 }
 0x13c   : > { %v1252_v46 = vadd.f32 %v1251_v42, %v1250_v40 }
 0x13d   : > { %v738_v47 = vmax.f32 %v624_v43, 0.0  ;;  %v754_v48 = vmax.f32 %v688_v44, 0.0  ;;  %v627_v49 = vadd.f32 %v1204_v45, %v1712_v50 }
 0x13e   : > { %v691_v51 = vadd.f32 %v1252_v46, %v1712_v50 }
 0x13f   : > { %v1143_v52 = vpack.c.bf16 %v738_v47, %v738_v47  ;;  %v1159_v53 = vpack.c.bf16 %v754_v48, %v754_v48  ;;  %v739_v54 = vmax.f32 %v627_v49, 0.0  ;;  %v1205_v56 = vpop.f32.mrb[12].mxu0  ;;  %v1253_v57 = vpop.f32.mrb[12].mxu1 }
 0x140   : > { %v755_v55 = vmax.f32 %v691_v51, 0.0  ;;  %v1206_v58 = vpop.f32.mrb[13].mxu0  ;;  %v1254_v59 = vpop.f32.mrb[13].mxu1 }
 0x141   : > { %899 = vst.msk [vmem:[%s1721_s29 + $0x10] sm:$0xf] %vm894_vm0, %v1143_v52  ;;  %915 = vst.msk [vmem:[%s1721_s29 + $0x50] sm:$0xf] %vm894_vm0, %v1159_v53  ;;  %v1144_v60 = vpack.c.bf16 %v739_v54, %v739_v54  ;;  %v1207_v62 = vadd.f32 %v1206_v58, %v1205_v56  ;;  %v1255_v63 = vadd.f32 %v1254_v59, %v1253_v57  ;;  %v1208_v0 = vpop.f32.mrb[14].mxu0  ;;  %v1256_v1 = vpop.f32.mrb[14].mxu1 }
 0x142   : > { %v1160_v61 = vpack.c.bf16 %v755_v55, %v755_v55  ;;  %v1209_v2 = vpop.f32.mrb[15].mxu0  ;;  %v1257_v3 = vpop.f32.mrb[15].mxu1 }
 0x143   : > { %900 = vst.msk [vmem:[%s1721_s29 + $0x14] sm:$0xf] %vm894_vm0, %v1144_v60  ;;  %v632_v4 = vadd.f32 %v1207_v62, %v1712_v50  ;;  %v696_v5 = vadd.f32 %v1255_v63, %v1712_v50  ;;  %v1210_v6 = vadd.f32 %v1209_v2, %v1208_v0  ;;  %v1258_v7 = vadd.f32 %v1257_v3, %v1256_v1 }
 0x144   : > { %916 = vst.msk [vmem:[%s1721_s29 + $0x54] sm:$0xf] %vm894_vm0, %v1160_v61 }
 0x145   : > { %v740_v8 = vmax.f32 %v632_v4, 0.0  ;;  %v756_v9 = vmax.f32 %v696_v5, 0.0  ;;  %v635_v10 = vadd.f32 %v1210_v6, %v1712_v50  ;;  %v699_v11 = vadd.f32 %v1258_v7, %v1712_v50 }
 0x147   : > { %v1145_v12 = vpack.c.bf16 %v740_v8, %v740_v8  ;;  %v1161_v13 = vpack.c.bf16 %v756_v9, %v756_v9  ;;  %v741_v14 = vmax.f32 %v635_v10, 0.0  ;;  %v757_v15 = vmax.f32 %v699_v11, 0.0  ;;  %v1211_v16 = vpop.f32.mrb[16].mxu0  ;;  %v1259_v17 = vpop.f32.mrb[16].mxu1 }
 0x148   : > { %v1212_v18 = vpop.f32.mrb[17].mxu0  ;;  %v1260_v19 = vpop.f32.mrb[17].mxu1 }
 0x149   : > { %901 = vst.msk [vmem:[%s1721_s29 + $0x18] sm:$0xf] %vm894_vm0, %v1145_v12  ;;  %917 = vst.msk [vmem:[%s1721_s29 + $0x58] sm:$0xf] %vm894_vm0, %v1161_v13  ;;  %v1146_v20 = vpack.c.bf16 %v741_v14, %v741_v14  ;;  %v1162_v21 = vpack.c.bf16 %v757_v15, %v757_v15  ;;  %v1213_v22 = vadd.f32 %v1212_v18, %v1211_v16  ;;  %v1214_v24 = vpop.f32.mrb[18].mxu0  ;;  %v1262_v25 = vpop.f32.mrb[18].mxu1 }
 0x14a   : > { %v1261_v23 = vadd.f32 %v1260_v19, %v1259_v17  ;;  %v1215_v26 = vpop.f32.mrb[19].mxu0  ;;  %v1263_v27 = vpop.f32.mrb[19].mxu1 }
 0x14b   : > { %902 = vst.msk [vmem:[%s1721_s29 + $0x1c] sm:$0xf] %vm894_vm0, %v1146_v20  ;;  %918 = vst.msk [vmem:[%s1721_s29 + $0x5c] sm:$0xf] %vm894_vm0, %v1162_v21  ;;  %v640_v28 = vadd.f32 %v1213_v22, %v1712_v50  ;;  %v1216_v30 = vadd.f32 %v1215_v26, %v1214_v24  ;;  %v1264_v31 = vadd.f32 %v1263_v27, %v1262_v25 }
 0x14c   : > { %v704_v29 = vadd.f32 %v1261_v23, %v1712_v50 }
 0x14d   : > { %v742_v32 = vmax.f32 %v640_v28, 0.0  ;;  %v643_v34 = vadd.f32 %v1216_v30, %v1712_v50  ;;  %v707_v35 = vadd.f32 %v1264_v31, %v1712_v50 }
 0x14e   : > { %v758_v33 = vmax.f32 %v704_v29, 0.0 }
 0x14f   : > { %v1147_v36 = vpack.c.bf16 %v742_v32, %v742_v32  ;;  %v743_v38 = vmax.f32 %v643_v34, 0.0  ;;  %v759_v39 = vmax.f32 %v707_v35, 0.0  ;;  %v1217_v40 = vpop.f32.mrb[20].mxu0  ;;  %v1265_v41 = vpop.f32.mrb[20].mxu1 }
 0x150   : > { %v1163_v37 = vpack.c.bf16 %v758_v33, %v758_v33  ;;  %v1218_v42 = vpop.f32.mrb[21].mxu0  ;;  %v1266_v43 = vpop.f32.mrb[21].mxu1 }
 0x151   : > { %903 = vst.msk [vmem:[%s1721_s29 + $0x20] sm:$0xf] %vm894_vm0, %v1147_v36  ;;  %v1148_v44 = vpack.c.bf16 %v743_v38, %v743_v38  ;;  %v1164_v45 = vpack.c.bf16 %v759_v39, %v759_v39  ;;  %v1219_v46 = vadd.f32 %v1218_v42, %v1217_v40  ;;  %v1267_v47 = vadd.f32 %v1266_v43, %v1265_v41  ;;  %v1220_v48 = vpop.f32.mrb[22].mxu0  ;;  %v1268_v49 = vpop.f32.mrb[22].mxu1 }
 0x152   : > { %919 = vst.msk [vmem:[%s1721_s29 + $0x60] sm:$0xf] %vm894_vm0, %v1163_v37  ;;  %v1221_v51 = vpop.f32.mrb[23].mxu0  ;;  %v1269_v52 = vpop.f32.mrb[23].mxu1 }
 0x153   : > { %904 = vst.msk [vmem:[%s1721_s29 + $0x24] sm:$0xf] %vm894_vm0, %v1148_v44  ;;  %920 = vst.msk [vmem:[%s1721_s29 + $0x64] sm:$0xf] %vm894_vm0, %v1164_v45  ;;  %v648_v53 = vadd.f32 %v1219_v46, %v1712_v50  ;;  %v712_v54 = vadd.f32 %v1267_v47, %v1712_v50  ;;  %v1222_v55 = vadd.f32 %v1221_v51, %v1220_v48 }
 0x154   : > { %v1270_v56 = vadd.f32 %v1269_v52, %v1268_v49 }
 0x155   : > { %v744_v57 = vmax.f32 %v648_v53, 0.0  ;;  %v760_v58 = vmax.f32 %v712_v54, 0.0  ;;  %v651_v59 = vadd.f32 %v1222_v55, %v1712_v50 }
 0x156   : > { %v715_v60 = vadd.f32 %v1270_v56, %v1712_v50 }
 0x157   : > { %v1149_v61 = vpack.c.bf16 %v744_v57, %v744_v57  ;;  %v1165_v62 = vpack.c.bf16 %v760_v58, %v760_v58  ;;  %v745_v63 = vmax.f32 %v651_v59, 0.0  ;;  %v1223_v1 = vpop.f32.mrb[24].mxu0  ;;  %v1271_v2 = vpop.f32.mrb[24].mxu1 }
 0x158   : > { %v761_v0 = vmax.f32 %v715_v60, 0.0  ;;  %v1224_v3 = vpop.f32.mrb[25].mxu0  ;;  %v1272_v4 = vpop.f32.mrb[25].mxu1 }
 0x159   : > { %905 = vst.msk [vmem:[%s1721_s29 + $0x28] sm:$0xf] %vm894_vm0, %v1149_v61  ;;  %921 = vst.msk [vmem:[%s1721_s29 + $0x68] sm:$0xf] %vm894_vm0, %v1165_v62  ;;  %v1150_v5 = vpack.c.bf16 %v745_v63, %v745_v63  ;;  %v1225_v7 = vadd.f32 %v1224_v3, %v1223_v1  ;;  %v1273_v8 = vadd.f32 %v1272_v4, %v1271_v2  ;;  %v1226_v9 = vpop.f32.mrb[26].mxu0  ;;  %v1274_v10 = vpop.f32.mrb[26].mxu1 }
 0x15a   : > { %v1166_v6 = vpack.c.bf16 %v761_v0, %v761_v0  ;;  %v1227_v11 = vpop.f32.mrb[27].mxu0  ;;  %v1275_v12 = vpop.f32.mrb[27].mxu1 }
 0x15b   : > { %906 = vst.msk [vmem:[%s1721_s29 + $0x2c] sm:$0xf] %vm894_vm0, %v1150_v5  ;;  %v656_v13 = vadd.f32 %v1225_v7, %v1712_v50  ;;  %v720_v14 = vadd.f32 %v1273_v8, %v1712_v50  ;;  %v1228_v15 = vadd.f32 %v1227_v11, %v1226_v9  ;;  %v1276_v16 = vadd.f32 %v1275_v12, %v1274_v10 }
 0x15c   : > { %922 = vst.msk [vmem:[%s1721_s29 + $0x6c] sm:$0xf] %vm894_vm0, %v1166_v6 }
 0x15d   : > { %v746_v17 = vmax.f32 %v656_v13, 0.0  ;;  %v762_v18 = vmax.f32 %v720_v14, 0.0  ;;  %v659_v19 = vadd.f32 %v1228_v15, %v1712_v50  ;;  %v723_v20 = vadd.f32 %v1276_v16, %v1712_v50 }
 0x15f   : > { %v1151_v21 = vpack.c.bf16 %v746_v17, %v746_v17  ;;  %v1167_v22 = vpack.c.bf16 %v762_v18, %v762_v18  ;;  %v747_v23 = vmax.f32 %v659_v19, 0.0  ;;  %v763_v24 = vmax.f32 %v723_v20, 0.0  ;;  %v1229_v25 = vpop.f32.mrb[28].mxu0  ;;  %v1277_v26 = vpop.f32.mrb[28].mxu1 }
 0x160   : > { %v1230_v27 = vpop.f32.mrb[29].mxu0  ;;  %v1278_v28 = vpop.f32.mrb[29].mxu1 }
 0x161   : > { %907 = vst.msk [vmem:[%s1721_s29 + $0x30] sm:$0xf] %vm894_vm0, %v1151_v21  ;;  %923 = vst.msk [vmem:[%s1721_s29 + $0x70] sm:$0xf] %vm894_vm0, %v1167_v22  ;;  %v1152_v29 = vpack.c.bf16 %v747_v23, %v747_v23  ;;  %v1168_v30 = vpack.c.bf16 %v763_v24, %v763_v24  ;;  %v1231_v31 = vadd.f32 %v1230_v27, %v1229_v25  ;;  %v1232_v33 = vpop.f32.mrb[30].mxu0  ;;  %v1280_v34 = vpop.f32.mrb[30].mxu1 }
 0x162   : > { %v1279_v32 = vadd.f32 %v1278_v28, %v1277_v26  ;;  %v1233_v35 = vpop.f32.mrb[31].mxu0  ;;  %v1281_v36 = vpop.f32.mrb[31].mxu1 }
 0x163   : > { %908 = vst.msk [vmem:[%s1721_s29 + $0x34] sm:$0xf] %vm894_vm0, %v1152_v29  ;;  %924 = vst.msk [vmem:[%s1721_s29 + $0x74] sm:$0xf] %vm894_vm0, %v1168_v30  ;;  %v664_v37 = vadd.f32 %v1231_v31, %v1712_v50  ;;  %v1234_v39 = vadd.f32 %v1233_v35, %v1232_v33  ;;  %v1282_v40 = vadd.f32 %v1281_v36, %v1280_v34 }
 0x164   : > { %v728_v38 = vadd.f32 %v1279_v32, %v1712_v50 }
 0x165   : > { %v748_v41 = vmax.f32 %v664_v37, 0.0  ;;  %v667_v43 = vadd.f32 %v1234_v39, %v1712_v50  ;;  %v731_v44 = vadd.f32 %v1282_v40, %v1712_v50 }
 0x166   : > { %v764_v42 = vmax.f32 %v728_v38, 0.0 }
 0x167   : > { %v1153_v45 = vpack.c.bf16 %v748_v41, %v748_v41  ;;  %v749_v47 = vmax.f32 %v667_v43, 0.0  ;;  %v765_v48 = vmax.f32 %v731_v44, 0.0 }
 0x168   : > { %v1169_v46 = vpack.c.bf16 %v764_v42, %v764_v42 }
 0x169   : > { %909 = vst.msk [vmem:[%s1721_s29 + $0x38] sm:$0xf] %vm894_vm0, %v1153_v45  ;;  %v1154_v49 = vpack.c.bf16 %v749_v47, %v749_v47  ;;  %v1170_v51 = vpack.c.bf16 %v765_v48, %v765_v48 }
 0x16a   : > { %925 = vst.msk [vmem:[%s1721_s29 + $0x78] sm:$0xf] %vm894_vm0, %v1169_v46 }
 0x16b   : > { %910 = vst.msk [vmem:[%s1721_s29 + $0x3c] sm:$0xf] %vm894_vm0, %v1154_v49  ;;  %926 = vst.msk [vmem:[%s1721_s29 + $0x7c] sm:$0xf] %vm894_vm0, %v1170_v51 }
 0x16c PF: > { %s16_s17 = sadd.s32 1, %s1500_s17   ;;  %s1840_s12 = smov %s1484_s13 }
 0x16d   : > { %p13_p9 = scmp.ge.s32.totalorder %s16_s17, 10   ;;  %s1841_s13 = smov %s1488_s14 }
 0x16e   : > { %s1842_s14 = smov %s1574_s24  ;;  %s1843_s15 = smov %s1496_s16 }
 0x16f   : > { %s1844_s16 = smov %s1846_s19  ;;  %15 = sbr.rel (!%p13_p9) target bundleno = 4 (0x4), region = 78 }
 0x176   :  { %955 = vsyncpa [#allocation3], 1 }
 0x177   :  { %957 = vsyncpa [#allocation3 + $0x1], 1 }

</bundles_post_ra>
